<compile_context>
chip_gen: v7x
topology: tpu7x:2x2x1
jax: 0.10.0
libtpu: 0.0.40
codegen_flags: <defaults>
</compile_context>

<pallas_src>
import jax
import jax.numpy as jnp
from jax.experimental import pallas as pl
from jax.experimental.pallas import tpu as pltpu

# Model sizes implied by the PyTorch module (sales dataset: 9 features -> total_vendas).
NUM_INPUTS = 9
L1 = 50
L2 = 75
L3 = 15
NUM_OUTPUTS = 1


def mlp_kernel(x_ref, w1_ref, b1_ref, w2_ref, b2_ref, w3_ref, b3_ref,
               w4_ref, b4_ref, o_ref):
    """One batch tile, computed as y.T = chain(W @ x.T + b); output block is [1, TB] (lane-dense)."""
    # x_ref: [TB, NUM_INPUTS] f32.  One small XLU transpose so the batch rides the lane axis.
    xt = x_ref[...].T.astype(jnp.bfloat16)                                   # [NUM_INPUTS, TB]

    h1 = jnp.dot(w1_ref[...], xt, preferred_element_type=jnp.float32) + b1_ref[...]
    h1 = jnp.maximum(h1, 0.0)                                                # [L1, TB] f32
    # dropout(p=0.25): identity in eval mode
    # TODO(synk): training-mode dropout would need pltpu.prng_seed/prng_random_bits + 1/(1-p) scaling.

    h2 = jnp.dot(w2_ref[...], h1.astype(jnp.bfloat16),
                 preferred_element_type=jnp.float32) + b2_ref[...]
    h2 = jnp.maximum(h2, 0.0)                                                # [L2, TB] f32

    h3 = jnp.dot(w3_ref[...], h2.astype(jnp.bfloat16),
                 preferred_element_type=jnp.float32) + b3_ref[...]
    h3 = jnp.maximum(h3, 0.0)                                                # [L3, TB] f32

    out = jnp.dot(w4_ref[...], h3.astype(jnp.bfloat16),
                  preferred_element_type=jnp.float32) + b4_ref[...]          # [NUM_OUTPUTS, TB]
    o_ref[...] = out.astype(o_ref.dtype)


def net_forward(x, kparams, *, block_batch=1024):
    """x: [batch, NUM_INPUTS] f32; kparams from prepare_params(). Returns [batch, NUM_OUTPUTS] f32."""
    w1, b1, w2, b2, w3, b3, w4, b4 = kparams
    batch = x.shape[0]
    tb = int(block_batch)
    assert tb % 128 == 0, "block_batch must be a multiple of 128 (lane width)"

    pad = (-batch) % tb
    if pad:
        x = jnp.pad(x, ((0, pad), (0, 0)))                                   # batch remainder
    batch_pad = batch + pad
    grid = (batch_pad // tb,)

    const = lambda i: (0, 0)                                                 # resident weights/biases
    in_specs = [
        pl.BlockSpec((tb, NUM_INPUTS), lambda i: (i, 0)),                    # streamed x tile
        pl.BlockSpec((L1, NUM_INPUTS), const),
        pl.BlockSpec((L1, 1), const),
        pl.BlockSpec((L2, L1), const),
        pl.BlockSpec((L2, 1), const),
        pl.BlockSpec((L3, L2), const),
        pl.BlockSpec((L3, 1), const),
        pl.BlockSpec((NUM_OUTPUTS, L3), const),
        pl.BlockSpec((NUM_OUTPUTS, 1), const),
    ]
    out_specs = pl.BlockSpec((NUM_OUTPUTS, tb), lambda i: (0, i))            # lane-dense output slab

    y_t = pl.pallas_call(
        mlp_kernel,
        out_shape=jax.ShapeDtypeStruct((NUM_OUTPUTS, batch_pad), jnp.float32),
        grid=grid,
        in_specs=in_specs,
        out_specs=out_specs,
        compiler_params=pltpu.CompilerParams(
            dimension_semantics=("parallel",)),
    )(x, w1, b1, w2, b2, w3, b3, w4, b4)

    return y_t[:, :batch].T                                                  # [batch, NUM_OUTPUTS]


def init_params(key):
    """PyTorch nn.Linear-style params: W (out_features, in_features), b (out_features,),
    U(-1/sqrt(fan_in), 1/sqrt(fan_in)), f32."""
    dims = [(NUM_INPUTS, L1), (L1, L2), (L2, L3), (L3, NUM_OUTPUTS)]
    params = []
    for fan_in, fan_out in dims:
        key, kw, kb = jax.random.split(key, 3)
        bound = fan_in ** -0.5
        w = jax.random.uniform(kw, (fan_out, fan_in), jnp.float32, -bound, bound)
        b = jax.random.uniform(kb, (fan_out,), jnp.float32, -bound, bound)
        params += [w, b]
    return tuple(params)


def prepare_params(params):
    """Kernel layout: weights keep the PyTorch (out, in) layout but are cast to bf16
    (MXU operands); biases become f32 columns (out, 1) broadcasting over the lane axis."""
    out = []
    for i in range(0, len(params), 2):
        w, b = params[i], params[i + 1]
        out += [w.astype(jnp.bfloat16), b.reshape(-1, 1).astype(jnp.float32)]
    return tuple(out)


def net_forward_ref(x, kparams):
    """Pure-JAX reference with the same bf16-operand / f32-accumulate numerics as the kernel."""
    w1, b1, w2, b2, w3, b3, w4, b4 = kparams
    h = x.T.astype(jnp.bfloat16)
    h = jnp.maximum(jnp.dot(w1, h, preferred_element_type=jnp.float32) + b1, 0.0)
    h = jnp.maximum(jnp.dot(w2, h.astype(jnp.bfloat16), preferred_element_type=jnp.float32) + b2, 0.0)
    h = jnp.maximum(jnp.dot(w3, h.astype(jnp.bfloat16), preferred_element_type=jnp.float32) + b3, 0.0)
    o = jnp.dot(w4, h.astype(jnp.bfloat16), preferred_element_type=jnp.float32) + b4
    return o.T


def net_forward_ref_f32(x, params):
    """Full-f32 reference matching the PyTorch module (eval mode) exactly."""
    w1, b1, w2, b2, w3, b3, w4, b4 = params
    h = jnp.maximum(x @ w1.T + b1, 0.0)
    h = jnp.maximum(h @ w2.T + b2, 0.0)
    h = jnp.maximum(h @ w3.T + b3, 0.0)
    return h @ w4.T + b4


if __name__ == "__main__":
    key = jax.random.PRNGKey(0)
    key, kx = jax.random.split(key)
    batch = 300                      # small demo batch; exercises 3 grid steps + remainder padding
    x = jax.random.normal(kx, (batch, NUM_INPUTS), jnp.float32)

    params = init_params(key)        # PyTorch-convention f32 params
    kparams = prepare_params(params) # kernel-layout params (bf16 W, (out,1) f32 b)

    out = net_forward(x, kparams, block_batch=128)
    out = jax.block_until_ready(out)

    assert out.shape == (batch, NUM_OUTPUTS)
    ref = net_forward_ref(x, kparams)          # bit-matched numerics (bf16 MXU operands)
    assert jnp.allclose(out, ref, atol=1e-3, rtol=1e-3), float(jnp.max(jnp.abs(out - ref)))
    ref32 = net_forward_ref_f32(x, params)     # f32 PyTorch semantics (small bf16 drift expected)
    assert jnp.allclose(out, ref32, atol=1e-1, rtol=1e-1), float(jnp.max(jnp.abs(out - ref32)))
    print("KERNEL_OK")
</pallas_src>

<mosaic_0001>
module attributes {stable_mosaic.version = 11 : i64} {
  func.func @mlp_kernel(%arg0: i32, %arg1: memref<128x9xf32, #tpu.memory_space<vmem>>, %arg2: memref<50x9xbf16, #tpu.memory_space<vmem>>, %arg3: memref<50x1xf32, #tpu.memory_space<vmem>>, %arg4: memref<75x50xbf16, #tpu.memory_space<vmem>>, %arg5: memref<75x1xf32, #tpu.memory_space<vmem>>, %arg6: memref<15x75xbf16, #tpu.memory_space<vmem>>, %arg7: memref<15x1xf32, #tpu.memory_space<vmem>>, %arg8: memref<1x15xbf16, #tpu.memory_space<vmem>>, %arg9: memref<1x1xf32, #tpu.memory_space<vmem>>, %arg10: memref<1x128xf32, #tpu.memory_space<vmem>>) attributes {dimension_semantics = [#tpu.dimension_semantics<parallel>], iteration_bounds = array<i64: 3>, scalar_prefetch = 0 : i64, scratch_operands = 0 : i64, tpu.core_type = #tpu.core_type<tc>, window_params = [{transform_indices = @transform_0, window_bounds = array<i64: 128, 9>}, {pipeline_mode = #tpu.pipeline_mode<synchronous>, transform_indices = @transform_1, window_bounds = array<i64: 50, 9>}, {pipeline_mode = #tpu.pipeline_mode<synchronous>, transform_indices = @transform_2, window_bounds = array<i64: 50, 1>}, {pipeline_mode = #tpu.pipeline_mode<synchronous>, transform_indices = @transform_3, window_bounds = array<i64: 75, 50>}, {pipeline_mode = #tpu.pipeline_mode<synchronous>, transform_indices = @transform_4, window_bounds = array<i64: 75, 1>}, {pipeline_mode = #tpu.pipeline_mode<synchronous>, transform_indices = @transform_5, window_bounds = array<i64: 15, 75>}, {pipeline_mode = #tpu.pipeline_mode<synchronous>, transform_indices = @transform_6, window_bounds = array<i64: 15, 1>}, {pipeline_mode = #tpu.pipeline_mode<synchronous>, transform_indices = @transform_7, window_bounds = array<i64: 1, 15>}, {pipeline_mode = #tpu.pipeline_mode<synchronous>, transform_indices = @transform_8, window_bounds = array<i64: 1, 1>}, {transform_indices = @transform_9, window_bounds = array<i64: 1, 128>}]} {
    %c0 = arith.constant 0 : index
    %c0_0 = arith.constant 0 : index
    %0 = vector.load %arg1[%c0, %c0_0] : memref<128x9xf32, #tpu.memory_space<vmem>>, vector<128x9xf32>
    %1 = tpu.transpose %0, [1, 0] : vector<128x9xf32> -> vector<9x128xf32>
    %2 = arith.truncf %1 : vector<9x128xf32> to vector<9x128xbf16>
    %c0_1 = arith.constant 0 : index
    %c0_2 = arith.constant 0 : index
    %3 = vector.load %arg2[%c0_1, %c0_2] : memref<50x9xbf16, #tpu.memory_space<vmem>>, vector<50x9xbf16>
    %cst = arith.constant dense<0.000000e+00> : vector<50x128xf32>
    %4 = tpu.matmul %3, %2, %cst {dimension_numbers = #tpu.dot_dimension_numbers<[1], [0], [0], [1], [0, 0, 1, 1], [], []>} : vector<50x9xbf16>, vector<9x128xbf16>, vector<50x128xf32> -> vector<50x128xf32>
    %c0_3 = arith.constant 0 : index
    %c0_4 = arith.constant 0 : index
    %5 = vector.load %arg3[%c0_3, %c0_4] : memref<50x1xf32, #tpu.memory_space<vmem>>, vector<50x1xf32>
    %6 = vector.broadcast %5 : vector<50x1xf32> to vector<50x128xf32>
    %7 = arith.addf %4, %6 : vector<50x128xf32>
    %cst_5 = arith.constant 0.000000e+00 : f32
    %8 = vector.broadcast %cst_5 : f32 to vector<50x128xf32>
    %9 = arith.maximumf %7, %8 : vector<50x128xf32>
    %c0_6 = arith.constant 0 : index
    %c0_7 = arith.constant 0 : index
    %10 = vector.load %arg4[%c0_6, %c0_7] : memref<75x50xbf16, #tpu.memory_space<vmem>>, vector<75x50xbf16>
    %11 = arith.truncf %9 : vector<50x128xf32> to vector<50x128xbf16>
    %cst_8 = arith.constant dense<0.000000e+00> : vector<75x128xf32>
    %12 = tpu.matmul %10, %11, %cst_8 {dimension_numbers = #tpu.dot_dimension_numbers<[1], [0], [0], [1], [0, 0, 1, 1], [], []>} : vector<75x50xbf16>, vector<50x128xbf16>, vector<75x128xf32> -> vector<75x128xf32>
    %c0_9 = arith.constant 0 : index
    %c0_10 = arith.constant 0 : index
    %13 = vector.load %arg5[%c0_9, %c0_10] : memref<75x1xf32, #tpu.memory_space<vmem>>, vector<75x1xf32>
    %14 = vector.broadcast %13 : vector<75x1xf32> to vector<75x128xf32>
    %15 = arith.addf %12, %14 : vector<75x128xf32>
    %cst_11 = arith.constant 0.000000e+00 : f32
    %16 = vector.broadcast %cst_11 : f32 to vector<75x128xf32>
    %17 = arith.maximumf %15, %16 : vector<75x128xf32>
    %c0_12 = arith.constant 0 : index
    %c0_13 = arith.constant 0 : index
    %18 = vector.load %arg6[%c0_12, %c0_13] : memref<15x75xbf16, #tpu.memory_space<vmem>>, vector<15x75xbf16>
    %19 = arith.truncf %17 : vector<75x128xf32> to vector<75x128xbf16>
    %cst_14 = arith.constant dense<0.000000e+00> : vector<15x128xf32>
    %20 = tpu.matmul %18, %19, %cst_14 {dimension_numbers = #tpu.dot_dimension_numbers<[1], [0], [0], [1], [0, 0, 1, 1], [], []>} : vector<15x75xbf16>, vector<75x128xbf16>, vector<15x128xf32> -> vector<15x128xf32>
    %c0_15 = arith.constant 0 : index
    %c0_16 = arith.constant 0 : index
    %21 = vector.load %arg7[%c0_15, %c0_16] : memref<15x1xf32, #tpu.memory_space<vmem>>, vector<15x1xf32>
    %22 = vector.broadcast %21 : vector<15x1xf32> to vector<15x128xf32>
    %23 = arith.addf %20, %22 : vector<15x128xf32>
    %cst_17 = arith.constant 0.000000e+00 : f32
    %24 = vector.broadcast %cst_17 : f32 to vector<15x128xf32>
    %25 = arith.maximumf %23, %24 : vector<15x128xf32>
    %c0_18 = arith.constant 0 : index
    %c0_19 = arith.constant 0 : index
    %26 = vector.load %arg8[%c0_18, %c0_19] : memref<1x15xbf16, #tpu.memory_space<vmem>>, vector<1x15xbf16>
    %27 = arith.truncf %25 : vector<15x128xf32> to vector<15x128xbf16>
    %cst_20 = arith.constant dense<0.000000e+00> : vector<1x128xf32>
    %28 = tpu.matmul %26, %27, %cst_20 {dimension_numbers = #tpu.dot_dimension_numbers<[1], [0], [0], [1], [0, 0, 1, 1], [], []>} : vector<1x15xbf16>, vector<15x128xbf16>, vector<1x128xf32> -> vector<1x128xf32>
    %c0_21 = arith.constant 0 : index
    %c0_22 = arith.constant 0 : index
    %29 = vector.load %arg9[%c0_21, %c0_22] : memref<1x1xf32, #tpu.memory_space<vmem>>, vector<1x1xf32>
    %30 = vector.broadcast %29 : vector<1x1xf32> to vector<1x128xf32>
    %31 = arith.addf %28, %30 : vector<1x128xf32>
    %c0_23 = arith.constant 0 : index
    %c0_24 = arith.constant 0 : index
    %32 = vector.load %arg10[%c0_23, %c0_24] : memref<1x128xf32, #tpu.memory_space<vmem>>, vector<1x128xf32>
    tpu.vector_store %arg10[%c0_23, %c0_24], %31 {strides = array<i32>} : memref<1x128xf32, #tpu.memory_space<vmem>>, vector<1x128xf32>,
    return
  }
  func.func @transform_0(%arg0: i32) -> (i32, i32) {
    %c0_i32 = arith.constant 0 : i32
    %c0_i32_0 = arith.constant 0 : i32
    return %arg0, %c0_i32 : i32, i32
  }
  func.func @transform_1(%arg0: i32) -> (i32, i32) {
    %c0_i32 = arith.constant 0 : i32
    %c0_i32_0 = arith.constant 0 : i32
    %c0_i32_1 = arith.constant 0 : i32
    return %c0_i32, %c0_i32_0 : i32, i32
  }
  func.func @transform_2(%arg0: i32) -> (i32, i32) {
    %c0_i32 = arith.constant 0 : i32
    %c0_i32_0 = arith.constant 0 : i32
    %c0_i32_1 = arith.constant 0 : i32
    return %c0_i32, %c0_i32_0 : i32, i32
  }
  func.func @transform_3(%arg0: i32) -> (i32, i32) {
    %c0_i32 = arith.constant 0 : i32
    %c0_i32_0 = arith.constant 0 : i32
    %c0_i32_1 = arith.constant 0 : i32
    return %c0_i32, %c0_i32_0 : i32, i32
  }
  func.func @transform_4(%arg0: i32) -> (i32, i32) {
    %c0_i32 = arith.constant 0 : i32
    %c0_i32_0 = arith.constant 0 : i32
    %c0_i32_1 = arith.constant 0 : i32
    return %c0_i32, %c0_i32_0 : i32, i32
  }
  func.func @transform_5(%arg0: i32) -> (i32, i32) {
    %c0_i32 = arith.constant 0 : i32
    %c0_i32_0 = arith.constant 0 : i32
    %c0_i32_1 = arith.constant 0 : i32
    return %c0_i32, %c0_i32_0 : i32, i32
  }
  func.func @transform_6(%arg0: i32) -> (i32, i32) {
    %c0_i32 = arith.constant 0 : i32
    %c0_i32_0 = arith.constant 0 : i32
    %c0_i32_1 = arith.constant 0 : i32
    return %c0_i32, %c0_i32_0 : i32, i32
  }
  func.func @transform_7(%arg0: i32) -> (i32, i32) {
    %c0_i32 = arith.constant 0 : i32
    %c0_i32_0 = arith.constant 0 : i32
    %c0_i32_1 = arith.constant 0 : i32
    return %c0_i32, %c0_i32_0 : i32, i32
  }
  func.func @transform_8(%arg0: i32) -> (i32, i32) {
    %c0_i32 = arith.constant 0 : i32
    %c0_i32_0 = arith.constant 0 : i32
    %c0_i32_1 = arith.constant 0 : i32
    return %c0_i32, %c0_i32_0 : i32, i32
  }
  func.func @transform_9(%arg0: i32) -> (i32, i32) {
    %c0_i32 = arith.constant 0 : i32
    %c0_i32_0 = arith.constant 0 : i32
    return %c0_i32, %arg0 : i32, i32
  }
}

</mosaic_0001>

<bundles_post_ra>
// kernel: tpu_custom_call.1
= control target key start
LH: loop header
LB: loop body
LE: loop exit
PB: predicated region body
PF: predicated region fallthrough
CT: control target
= control target key end

     0   :  { %s1480_s0 = inlined_call_operand.vmem [shape: f32[384,9], index: 0, kind: input, shape index: {}]   ;;  %s1481_s1 = inlined_call_operand.vmem [shape: bf16[50,9], index: 1, kind: input, shape index: {}]   ;;  %s1482_s2 = inlined_call_operand.vmem [shape: f32[50,1], index: 2, kind: input, shape index: {}]   ;;  %s1483_s3 = inlined_call_operand.vmem [shape: bf16[75,50], index: 3, kind: input, shape index: {}]   ;;  %s1484_s4 = inlined_call_operand.vmem [shape: f32[75,1], index: 4, kind: input, shape index: {}]   ;;  %s1485_s5 = inlined_call_operand.vmem [shape: bf16[15,75], index: 5, kind: input, shape index: {}]   ;;  %s1486_s6 = inlined_call_operand.vmem [shape: f32[15,1], index: 6, kind: input, shape index: {}]   ;;  %s1487_s7 = inlined_call_operand.vmem [shape: bf16[1,15], index: 7, kind: input, shape index: {}]   ;;  %s1488_s8 = inlined_call_operand.<no memory space> [shape: f32[1,1], index: 8, kind: input, shape index: {}]   ;;  %s1489_s9 = inlined_call_operand.hbm [shape: f32[1,384], index: 9, kind: output, shape index: {}]  }
   0x1   :  { %v14_v0 = vstv %s1488_s8 }
   0x2   :  { %15 = vst [vmem:[#allocation2] sm:$0x1] %v14_v0 }
   0x3   :  { %16 = vsyncpa [#allocation4], 0 }
   0x4   :  { %18 = vsyncpa [#allocation4 + $0x1], 0  ;;  %s1240_s11 = smov 0   ;;  %s1242_s12 = smov 0  }
   0x5   :  { %s1244_s13 = smov 0   ;;  %s1246_s14 = smov 0  }
   0x6 LB: > { %s952_s8 = sadd.s32 4294967295, %s1180_s14   ;;  %s953_s15 = sadd.s32 4294967294, %s1180_s14   ;;  %s1180_s14 = sphi %s1246_s14, %s1495_s14   ;;  %s1176_s13 = sphi %s1244_s13, %s1494_s13   ;;  %s1172_s12 = sphi %s1242_s12, %s1493_s12   ;;  %s1168_s11 = sphi %s1240_s11, %s1492_s11  }
   0x7   : > { %s1263_s16 = sadd.s32 1, %s1180_s14   ;;  %s225_s17 = sadd.s32 1, %s1176_s13 }
   0x8   : > { %s222_s18 = ssub.s32 %s1180_s14, %s1263_s16  ;;  %p235_p0 = scmp.ne.s32.totalorder %s1176_s13, %s1172_s12 }
   0x9   : > { %p223_p1 = scmp.eq.s32.totalorder %s222_s18, 0  ;;  %p236_p2 = scmp.eq.s32.totalorder %s952_s8, 2 }
   0xa   : > { %p241_p3 = scmp.ne.s32.totalorder %s1172_s12, %s1168_s11  ;;  %p242_p4 = scmp.eq.s32.totalorder %s953_s15, 2 }
   0xb   : > { %s1273_s19 = scalar_select %p223_p1, %s1176_s13, %s225_s17  }
   0xc   : > { %p1275_p5 = por %p236_p2, %p235_p0  ;;  %p1279_p6 = por %p242_p4, %p241_p3 }
   0xd   : > { %p956_p7 = scmp.ge.s32.totalorder %s1180_s14, 1  ;;  %p293_p8 = scmp.lt.s32.totalorder %s1180_s14, 4 }
   0xf   : > { %p294_p9 = pnand %p956_p7, %p293_p8 }
  0x10   : > { %s1285_s22 = sshll.u32 (!%p294_p9), %s952_s8, 4  ;;  %v1108_v5 = vld [vmem:[%s1481_s1] sm:$0xff] (!%p294_p9)   ;;  %vm451_vm0 = vcmask (!%p294_p9), 72704   ;;  %v1182_v8 = vmov (!%p294_p9), 0   ;;  %v392_v9 = vld [vmem:[%s1482_s2 + $0x8] sm:$0xff] (!%p294_p9)  ;;  %v393_v12 = vld [vmem:[%s1482_s2 + $0x10] sm:$0xff] (!%p294_p9) }
  0x11   : > { %297 = sbr.rel (%p294_p9) target bundleno = 1116 (0x45c), region = 56  ;;  %p329_p10 = scmp.lt.s32.totalorder (!%p294_p9), %s1285_s22, 47  ;;  %1007 = vmatprep.mubr.msk.bf16.mxu0 (!%p294_p9), %vm451_vm0, %v1108_v5  ;;  %v391_v7 = vld [vmem:[%s1482_s2] sm:$0xff] (!%p294_p9)  ;;  %1106 = vset.pattern.permute.xlu1 (!%p294_p9), %v1182_v8  ;;  %v394_v13 = vld [vmem:[%s1482_s2 + $0x18] sm:$0xff] (!%p294_p9)  ;;  %v396_v17 = vld [vmem:[%s1482_s2 + $0x28] sm:$0xff] (!%p294_p9)  ;;  %vm464_vm1 = vcmask (!%p294_p9), 1043456  }
  0x12   : > { %400 = vperm.xlu1 (!%p294_p9), %1106, %v391_v7   ;;  %v395_v15 = vld [vmem:[%s1482_s2 + $0x20] sm:$0xff] (!%p294_p9)  ;;  %v397_v19 = vld [vmem:[%s1482_s2 + $0x30] sm:$0x3] (!%p294_p9)  ;;  %v557_v23 = vld [vmem:[%s1484_s4 + $0x8] sm:$0xff] (!%p294_p9)  ;;  %vm465_vm2 = vcmask (!%p294_p9), 1044480   ;;  %v1183_v39 = vmov (!%p294_p9), 65535   ;;  %s1438_s30 = scalar_lea.hbm (!%p294_p9), %s1489_s9, %s1285_s22 }
  0x13   : > { %v556_v21 = vld [vmem:[%s1484_s4] sm:$0xff] (!%p294_p9)  ;;  %v558_v25 = vld [vmem:[%s1484_s4 + $0x10] sm:$0xff] (!%p294_p9)  ;;  %v559_v27 = vld [vmem:[%s1484_s4 + $0x18] sm:$0xff] (!%p294_p9)  ;;  %v466_v40 = vsel (!%p294_p9), %vm464_vm1, 4294967295, %v1183_v39  ;;  %v1184_v48 = vmov (!%p294_p9), 0.0   ;;  %vm1185_vm3 = vmmov (!%p294_p9), 0  }
  0x14   : > { %v560_v29 = vld [vmem:[%s1484_s4 + $0x20] sm:$0xff] (!%p294_p9)  ;;  %v561_v31 = vld [vmem:[%s1484_s4 + $0x28] sm:$0xff] (!%p294_p9)  ;;  %v562_v32 = vld [vmem:[%s1484_s4 + $0x30] sm:$0xff] (!%p294_p9)  ;;  %v467_v42 = vsel (!%p294_p9), %vm465_vm2, %v466_v40, 0  ;;  %1015 = vmatprep.subr.bf16.mxu1 (!%p294_p9), %v1184_v48  ;;  %1023 = vmatprep.mubr.msk.bf16.mxu1 (!%p294_p9), %vm1185_vm3, %v1184_v48  ;;  %vm657_vm4 = vcmask (!%p294_p9), 1040384   ;;  %vm641_vm5 = vcmask (!%p294_p9), 408576  }
  0x15   : > { %v563_v33 = vld [vmem:[%s1484_s4 + $0x38] sm:$0xff] (!%p294_p9)  ;;  %v564_v34 = vld [vmem:[%s1484_s4 + $0x40] sm:$0xff] (!%p294_p9)  ;;  %v752_v36 = vld [vmem:[%s1486_s6 + $0x8] sm:$0x7f] (!%p294_p9)  ;;  %vm772_vm6 = vcmask (!%p294_p9), 1045504   ;;  %vm768_vm7 = vcmask (!%p294_p9), 613376  }
  0x16   : > { %405 = vperm.xlu1 (!%p294_p9), %1106, %v392_v9   ;;  %v751_v35 = vld [vmem:[%s1486_s6] sm:$0xff] (!%p294_p9)  ;;  %v1109_v45 = vld [vmem:[%s1481_s1 + $0x8] sm:$0xff] (!%p294_p9)   ;;  %v1110_v46 = vld [vmem:[%s1481_s1 + $0x10] sm:$0xff] (!%p294_p9)   ;;  %vm837_vm8 = vcmask (!%p294_p9), 1046528   ;;  %vm838_vm9 = vcmask (!%p294_p9), 1047552   ;;  %vm833_vm10 = vcmask (!%p294_p9), 121856  }
  0x17   : > { %v823_v37 = vld [vmem:[#allocation2] sm:$0x1] (!%p294_p9)  ;;  %v1111_v47 = vld [vmem:[%s1481_s1 + $0x18] ss:$0 sps:$4 sm:$0x11] (!%p294_p9)   ;;  %s1186_s15 = smov (!%p294_p9), [#allocation3]  }
  0x18   : > { %s330_s23 = scalar_select %p329_p10, %s1285_s22, 47  ;;  %v565_v49 = vld [vmem:[%s1484_s4 + $0x48] sm:$0x7] }
  0x19   : > { %s1122_s17 = sshll.u32 %s1186_s15, 4  ;;  %s1123_s17 = int_to_ptr.vmem [resolvable:$false] %s1122_s17 }
  0x1a   : > { %s958_s24 = sshll.u32 %s330_s23, 3  ;;  %410 = vperm.xlu1 %1106, %v393_v12   ;;  %s1124_s18 = scalar_lea.vmem %s1123_s17, 32 }
  0x1b   : > { %s1292_s27 = scalar_lea.vmem %s1480_s0, %s958_s24 }
  0x1c   : > { %v335_v1 = vld [vmem:[%s1292_s27] sm:$0xff]  ;;  %v336_v2 = vld [vmem:[%s1292_s27 + $0x8] sm:$0xff]  ;;  %v337_v3 = vld [vmem:[%s1292_s27 + $0x10] sm:$0xff] }
  0x1d   : > { %351 = vxpose.xlu0.b32.start [1/16] (narrow) %v335_v1, 16  ;;  %v338_v4 = vld [vmem:[%s1292_s27 + $0x18] sm:$0xff]  ;;  %v339_v6 = vld [vmem:[%s1292_s27 + $0x20] sm:$0xff]  ;;  %v340_v10 = vld [vmem:[%s1292_s27 + $0x28] sm:$0xff] }
  0x1e   : > { %v341_v11 = vld [vmem:[%s1292_s27 + $0x30] sm:$0xff]  ;;  %v342_v14 = vld [vmem:[%s1292_s27 + $0x38] sm:$0xff]  ;;  %415 = vperm.xlu1 %1106, %v394_v13   ;;  %v343_v16 = vld [vmem:[%s1292_s27 + $0x40] sm:$0xff] }
  0x1f   : > { %v344_v18 = vld [vmem:[%s1292_s27 + $0x48] sm:$0xff]  ;;  %v345_v20 = vld [vmem:[%s1292_s27 + $0x50] sm:$0xff]  ;;  %v346_v22 = vld [vmem:[%s1292_s27 + $0x58] sm:$0xff] }
  0x20   : > { %v347_v24 = vld [vmem:[%s1292_s27 + $0x60] sm:$0xff]  ;;  %v348_v26 = vld [vmem:[%s1292_s27 + $0x68] sm:$0xff]  ;;  %v349_v28 = vld [vmem:[%s1292_s27 + $0x70] sm:$0xff] }
  0x21   : > { %352 = vxpose.xlu0.b32.cont [2/16] (narrow) %v336_v2, 16  ;;  %v350_v30 = vld [vmem:[%s1292_s27 + $0x78] sm:$0xff]  ;;  %s326_s27 = sand.u32 1, %s1172_s12  }
  0x22   : > { %420 = vperm.xlu1 %1106, %v395_v15   ;;  %s327_s25 = scalar_lea.vmem [#allocation3], %s326_s27  ;;  %s886_s10 = scalar_lea.sflag [#allocation4], %s326_s27 }
  0x23   : > { %s898_s26 = sshll.u32 %s327_s25, 4  ;;  %s1440_s26 = int_to_ptr.vmem [resolvable:$true] %s898_s26 }
  0x24   : > { %s1118_s8 = scalar_lea.vmem %s1440_s26, 16  ;;  %p1125_p0 = scmp.lt.s32.totalorder %s1440_s26, %s1123_s17 }
  0x25   : > { %353 = vxpose.xlu0.b32.cont [3/16] (narrow) %v337_v3, 16  ;;  %p1119_p11 = scmp.ne.s32.totalorder %s1440_s26, %s1118_s8  ;;  %p1126_p1 = scmp.lt.s32.totalorder %s1124_s18, %s1118_s8 }
  0x26   : > { %425 = vperm.xlu1 %1106, %v396_v17  }
  0x27   : > { %p1120_p12 = pnand %p1119_p11, %p1275_p5  ;;  %p1127_p2 = por %p1126_p1, %p1125_p0 }
  0x29   : > { %354 = vxpose.xlu0.b32.cont [4/16] (narrow) %v338_v4, 16  ;;  %p1121_p13 = pneg %p1120_p12 }
  0x2a   : > { %430 = vperm.xlu1 %1106, %v397_v19  }
  0x2b   : > { %p1128_p3 = pnand %p1127_p2, %p1121_p13 }
  0x2d   : > { %355 = vxpose.xlu0.b32.cont [5/16] (narrow) %v339_v6, 16 }
  0x2e   : > { %568 = vperm.xlu1 %1106, %v556_v21   ;;  %v1113_v21 = vld [vmem:[%s1483_s3 + $0x8] sm:$0xff]  }
  0x31   : > { %356 = vxpose.xlu0.b32.cont [6/16] (narrow) %v340_v10, 16 }
  0x32   : > { %573 = vperm.xlu1 %1106, %v557_v23   ;;  %v1115_v23 = vld [vmem:[%s1483_s3 + $0x18] sm:$0xff]  }
  0x35   : > { %357 = vxpose.xlu0.b32.cont [7/16] (narrow) %v341_v11, 16 }
  0x36   : > { %578 = vperm.xlu1 %1106, %v558_v25  }
  0x39   : > { %358 = vxpose.xlu0.b32.cont [8/16] (narrow) %v342_v14, 16 }
  0x3a   : > { %583 = vperm.xlu1 %1106, %v559_v27  }
  0x3d   : > { %359 = vxpose.xlu0.b32.cont [9/16] (narrow) %v343_v16, 16 }
  0x3e   : > { %588 = vperm.xlu1 %1106, %v560_v29  }
  0x41   : > { %360 = vxpose.xlu0.b32.cont [10/16] (narrow) %v344_v18, 16 }
  0x42   : > { %593 = vperm.xlu1 %1106, %v561_v31  }
  0x45   : > { %361 = vxpose.xlu0.b32.cont [11/16] (narrow) %v345_v20, 16  ;;  %v1112_v20 = vld [vmem:[%s1483_s3] sm:$0xff]  }
  0x46   : > { %598 = vperm.xlu1 %1106, %v562_v32  }
  0x49   : > { %362 = vxpose.xlu0.b32.cont [12/16] (narrow) %v346_v22, 16  ;;  %v1114_v22 = vld [vmem:[%s1483_s3 + $0x10] sm:$0xff]  }
  0x4a   : > { %603 = vperm.xlu1 %1106, %v563_v33  }
  0x4d   : > { %363 = vxpose.xlu0.b32.cont [13/16] (narrow) %v347_v24, 16  ;;  %v1116_v24 = vld [vmem:[%s1483_s3 + $0x20] sm:$0x3f]  }
  0x4e   : > { %608 = vperm.xlu1 %1106, %v564_v34  }
  0x51   : > { %364 = vxpose.xlu0.b32.cont [14/16] (narrow) %v348_v26, 16 }
  0x52   : > { %755 = vperm.xlu1 %1106, %v751_v35  }
  0x55   : > { %365 = vxpose.xlu0.b32.cont [15/16] (narrow) %v349_v28, 16 }
  0x56   : > { %760 = vperm.xlu1 %1106, %v752_v36  }
  0x59   : > { %366 = vxpose.xlu0.b32.end [16/16] (narrow) %v350_v30, 16 }
  0x5a   : > { %826 = vperm.xlu1 %1106, %v823_v37  }
  0x82   : > { %1107 = vset.pattern.permute.xlu0 %v1182_v8 }
  0x83   : > { %613 = vperm.xlu0 %1107, %v565_v49  }
  0x91   : > { %v401_v50 = vpop.permute.xlu1 %400 }
  0x95   : > { %v406_v51 = vpop.permute.xlu1 %405 }
  0x99   : > { %v411_v52 = vpop.permute.xlu1 %410 }
  0x9d   : > { %v367_v38 = vpop.trf.xlu0  ;;  %v416_v53 = vpop.permute.xlu1 %415 }
  0xa1   : > { %v368_v41 = vpop.trf.xlu0  ;;  %v421_v54 = vpop.permute.xlu1 %420 }
  0xa2   : > { %v383_v43 = vpack.c.bf16 %v368_v41, %v367_v38 }
  0xa4   : > { %v469_v44 = vand.u32 %v467_v42, %v383_v43 }
  0xa5   : > { %v426_v58 = vpop.permute.xlu1 %425 }
  0xa6   : > { %1005 = vmatprep.subr.bf16.mxu0 %v469_v44 }
  0xa7   : > { %1006 = vmatpush3.bf16.msra.mxu0 %v469_v44 }
  0xa8   : > { %1043 = vmatprep.subr.bf16.mxu0 %v1184_v48 }
  0xa9   : > { %v431_v5 = vpop.permute.xlu1 %430 }
  0xaa   : > { %1008 = vmatmul.mubr.msk.bf16.vlgmr.msra.gmra.mrb[0].mxu0 %vm451_vm0, %v1109_v45 }
  0xab   : > { %1011 = vmatprep.mubr.msk.bf16.mxu0 %vm451_vm0, %v1110_v46 }
  0xad   : > { %v569_v25 = vpop.permute.xlu1 %568 }
  0xb1   : > { %v574_v26 = vpop.permute.xlu1 %573 }
  0xb2   : > { %1012 = vmatmul.mubr.msk.bf16.gmra.mrb[4].mxu0 %vm451_vm0, %v1111_v47 }
  0xb3   : > { %1053 = vmatprep.mubr.msk.bf16.mxu0 %vm1185_vm3, %v1184_v48 }
  0xb5   : > { %v579_v27 = vpop.permute.xlu1 %578 }
  0xb9   : > { %v584_v29 = vpop.permute.xlu1 %583 }
  0xbd   : > { %v589_v37 = vpop.permute.xlu1 %588 }
  0xc1   : > { %v594_v46 = vpop.permute.xlu1 %593 }
 0x17d   : > { %v1009_v55 = vpop.f32.mrb[0].mxu0 }
 0x17e   : > { %v514_v56 = vadd.f32 %v1009_v55, %v411_v52  ;;  %v505_v57 = vpop.f32.mrb[1].mxu0  ;;  %v599_v55 = vpop.permute.xlu1 %598 }
 0x17f   : > { %v506_v59 = vadd.f32 %v505_v57, %v401_v50  ;;  %v1010_v60 = vpop.f32.mrb[2].mxu0 }
 0x180   : > { %v517_v61 = vadd.f32 %v1010_v60, %v416_v53  ;;  %v508_v62 = vpop.f32.mrb[3].mxu0  ;;  %v537_v0 = vmax.f32 %v514_v56, 0.0 }
 0x181   : > { %v509_v63 = vadd.f32 %v508_v62, %v406_v51  ;;  %v535_v2 = vmax.f32 %v506_v59, 0.0 }
 0x182   : > { %v538_v1 = vmax.f32 %v517_v61, 0.0  ;;  %v604_v62 = vpop.permute.xlu1 %603 }
 0x183   : > { %v536_v3 = vmax.f32 %v509_v63, 0.0 }
 0x184   : > { %v553_v4 = vpack.c.bf16 %v538_v1, %v537_v0 }
 0x185   : > { %v1013_v6 = vpop.f32.mrb[4].mxu0  ;;  %v552_v7 = vpack.c.bf16 %v536_v3, %v535_v2 }
 0x186   : > { %v530_v8 = vadd.f32 %v1013_v6, %v431_v5  ;;  %v521_v9 = vpop.f32.mrb[5].mxu0  ;;  %v609_v6 = vpop.permute.xlu1 %608 }
 0x187   : > { %v522_v10 = vadd.f32 %v521_v9, %v421_v54  ;;  %v1014_v11 = vpop.f32.mrb[6].mxu0  ;;  %1016 = vmatpush3.bf16.msra.mxu1 %v552_v7  ;;  %v614_v9 = vpop.permute.xlu0 %613 }
 0x188   : > { %v524_v12 = vpop.f32.mrb[7].mxu0  ;;  %1017 = vmatprep.subr.bf16.mxu1 %v1184_v48  ;;  %v541_v14 = vmax.f32 %v530_v8, 0.0 }
 0x189   : > { %v525_v13 = vadd.f32 %v524_v12, %v426_v58  ;;  %v539_v15 = vmax.f32 %v522_v10, 0.0 }
 0x18a   : > { %v555_v18 = vpack.c.bf16 %v541_v14, %v541_v14 }
 0x18b   : > { %v540_v16 = vmax.f32 %v525_v13, 0.0  ;;  %1018 = vmatpush3.bf16.msra.mxu1 %v553_v4  ;;  %v773_v13 = vsel %vm465_vm2, 4294967295, %v1183_v39 }
 0x18c   : > { %1019 = vmatprep.subr.bf16.mxu1 %v1184_v48  ;;  %v659_v19 = vsel %vm657_vm4, %v555_v18, 0  ;;  %v774_v18 = vsel %vm772_vm6, %v773_v13, 0 }
 0x18d   : > { %v554_v17 = vpack.c.bf16 %v540_v16, %v539_v15 }
 0x18f   : > { %1020 = vmatpush3.bf16.msra.mxu1 %v554_v17 }
 0x190   : > { %1021 = vmatprep.subr.bf16.mxu1 %v1184_v48 }
 0x193   : > { %1022 = vmatpush3.bf16.msra.mxu1 %v659_v19 }
 0x196   : > { %1024 = vmatmul.mubr.msk.bf16.vlgmr.msra.gmra.mrb[0].mxu1 %vm641_vm5, %v1112_v20 }
 0x197   : > { %1027 = vmatprep.mubr.msk.bf16.mxu1 %vm1185_vm3, %v1184_v48 }
 0x19e   : > { %1028 = vmatmul.mubr.msk.bf16.gmra.mrb[4].mxu1 %vm641_vm5, %v1113_v21  ;;  %v1117_v21 = vld [vmem:[%s1485_s5] sm:$0xff]  }
 0x19f   : > { %1031 = vmatprep.mubr.msk.bf16.mxu1 %vm1185_vm3, %v1184_v48 }
 0x1a6   : > { %1032 = vmatmul.mubr.msk.bf16.gmra.mrb[8].mxu1 %vm641_vm5, %v1114_v22  ;;  %v756_v22 = vpop.permute.xlu1 %755 }
 0x1a7   : > { %1035 = vmatprep.mubr.msk.bf16.mxu1 %vm1185_vm3, %v1184_v48 }
 0x1ae   : > { %1036 = vmatmul.mubr.msk.bf16.gmra.mrb[12].mxu1 %vm641_vm5, %v1115_v23 }
 0x1af   : > { %1039 = vmatprep.mubr.msk.bf16.mxu1 %vm1185_vm3, %v1184_v48 }
 0x1b6   : > { %1040 = vmatmul.mubr.msk.bf16.gmra.mrb[16].mxu1 %vm641_vm5, %v1116_v24 }
 0x269   : > { %v695_v28 = vpop.f32.mrb[0].mxu1 }
 0x26a   : > { %v696_v30 = vadd.f32 %v695_v28, %v569_v25  ;;  %v1025_v31 = vpop.f32.mrb[1].mxu1 }
 0x26b   : > { %v698_v32 = vpop.f32.mrb[2].mxu1 }
 0x26c   : > { %v699_v33 = vadd.f32 %v698_v32, %v574_v26  ;;  %v1026_v34 = vpop.f32.mrb[3].mxu1  ;;  %v734_v35 = vmax.f32 %v696_v30, 0.0  ;;  %v761_v26 = vpop.permute.xlu1 %760 }
 0x26e   : > { %v735_v36 = vmax.f32 %v699_v33, 0.0 }
 0x270   : > { %v746_v38 = vpack.c.bf16 %v735_v36, %v734_v35  ;;  %v829_v36 = vlaneseq }
 0x271   : > { %v703_v40 = vpop.f32.mrb[4].mxu1 }
 0x272   : > { %v704_v41 = vadd.f32 %v703_v40, %v579_v27  ;;  %v1029_v42 = vpop.f32.mrb[5].mxu1  ;;  %1044 = vmatpush3.bf16.msra.mxu0 %v746_v38 }
 0x273   : > { %v706_v43 = vpop.f32.mrb[6].mxu1  ;;  %1045 = vmatprep.subr.bf16.mxu0 %v1184_v48 }
 0x274   : > { %v707_v44 = vadd.f32 %v706_v43, %v584_v29  ;;  %v1030_v45 = vpop.f32.mrb[7].mxu1  ;;  %v736_v47 = vmax.f32 %v704_v41, 0.0  ;;  %v839_v29 = vsel %vm837_vm8, 4294967295, %v1183_v39  ;;  %v827_v39 = vpop.permute.xlu1 %826 }
 0x275   : > { %v840_v33 = vsel %vm838_vm9, %v839_v29, 0 }
 0x276   : > { %v737_v49 = vmax.f32 %v707_v44, 0.0 }
 0x278   : > { %v747_v50 = vpack.c.bf16 %v737_v49, %v736_v47 }
 0x279   : > { %v711_v51 = vpop.f32.mrb[8].mxu1 }
 0x27a   : > { %v712_v52 = vadd.f32 %v711_v51, %v589_v37  ;;  %v1033_v53 = vpop.f32.mrb[9].mxu1  ;;  %1046 = vmatpush3.bf16.msra.mxu0 %v747_v50  ;;  %v830_v37 = vshrl.u32 %v829_v36, 7 }
 0x27b   : > { %v714_v54 = vpop.f32.mrb[10].mxu1  ;;  %1047 = vmatprep.subr.bf16.mxu0 %v1184_v48 }
 0x27c   : > { %v715_v56 = vadd.f32 %v714_v54, %v594_v46  ;;  %v1034_v57 = vpop.f32.mrb[11].mxu1  ;;  %v738_v58 = vmax.f32 %v712_v52, 0.0  ;;  %v831_v38 = vsub.s32 0, %v830_v37 }
 0x27e   : > { %v739_v59 = vmax.f32 %v715_v56, 0.0  ;;  %v832_v40 = vrot.slane %v827_v39, %v831_v38 }
 0x280   : > { %v748_v60 = vpack.c.bf16 %v739_v59, %v738_v58 }
 0x281   : > { %v719_v61 = vpop.f32.mrb[12].mxu1 }
 0x282   : > { %v720_v63 = vadd.f32 %v719_v61, %v599_v55  ;;  %v1037_v0 = vpop.f32.mrb[13].mxu1  ;;  %1048 = vmatpush3.bf16.msra.mxu0 %v748_v60 }
 0x283   : > { %v722_v1 = vpop.f32.mrb[14].mxu1  ;;  %1049 = vmatprep.subr.bf16.mxu0 %v1184_v48 }
 0x284   : > { %v723_v2 = vadd.f32 %v722_v1, %v604_v62  ;;  %v1038_v3 = vpop.f32.mrb[15].mxu1  ;;  %v740_v4 = vmax.f32 %v720_v63, 0.0 }
 0x286   : > { %v741_v5 = vmax.f32 %v723_v2, 0.0 }
 0x288   : > { %v749_v7 = vpack.c.bf16 %v741_v5, %v740_v4 }
 0x289   : > { %v727_v8 = vpop.f32.mrb[16].mxu1 }
 0x28a   : > { %v728_v10 = vadd.f32 %v727_v8, %v609_v6  ;;  %v1041_v11 = vpop.f32.mrb[17].mxu1  ;;  %1050 = vmatpush3.bf16.msra.mxu0 %v749_v7 }
 0x28b   : > { %v730_v12 = vpop.f32.mrb[18].mxu1  ;;  %1051 = vmatprep.subr.bf16.mxu0 %v1184_v48 }
 0x28c   : > { %v731_v14 = vadd.f32 %v730_v12, %v614_v9  ;;  %v1042_v15 = vpop.f32.mrb[19].mxu1  ;;  %v742_v16 = vmax.f32 %v728_v10, 0.0 }
 0x28e   : > { %v743_v17 = vmax.f32 %v731_v14, 0.0 }
 0x290   : > { %v750_v19 = vpack.c.bf16 %v743_v17, %v742_v16 }
 0x292   : > { %v776_v20 = vand.u32 %v774_v18, %v750_v19 }
 0x294   : > { %1052 = vmatpush3.bf16.msra.mxu0 %v776_v20 }
 0x295   : > { %1057 = vmatprep.subr.bf16.mxu0 %v1184_v48 }
 0x297   : > { %1054 = vmatmul.mubr.msk.bf16.vlgmr.msra.gmra.mrb[8].mxu0 %vm768_vm7, %v1117_v21 }
 0x298   : > { %1059 = vmatprep.mubr.msk.bf16.mxu0 %vm1185_vm3, %v1184_v48  ;;  %v821_v48 = vld [vmem:[%s1487_s7] sm:$0x1] }
 0x36a   : > { %v812_v23 = vpop.f32.mrb[8].mxu0 }
 0x36b   : > { %v813_v24 = vadd.f32 %v812_v23, %v756_v22  ;;  %v1055_v25 = vpop.f32.mrb[9].mxu0 }
 0x36c   : > { %v815_v27 = vpop.f32.mrb[10].mxu0 }
 0x36d   : > { %v816_v28 = vadd.f32 %v815_v27, %v761_v26  ;;  %v1056_v30 = vpop.f32.mrb[11].mxu0  ;;  %v819_v31 = vmax.f32 %v813_v24, 0.0 }
 0x36f   : > { %v820_v32 = vmax.f32 %v816_v28, 0.0 }
 0x371   : > { %v822_v34 = vpack.c.bf16 %v820_v32, %v819_v31 }
 0x373   : > { %v842_v35 = vand.u32 %v840_v33, %v822_v34 }
 0x375   : > { %1058 = vmatpush3.bf16.msra.mxu0 %v842_v35 }
 0x378   : > { %1060 = vmatmul.mubr.msk.bf16.vlgmr.msra.gmra.mrb[12].mxu0 %vm833_vm10, %v821_v48 }
 0x44b   : > { %v878_v41 = vpop.f32.mrb[12].mxu0 }
 0x44c   : > { %v879_v42 = vadd.f32 %v878_v41, %v832_v40  ;;  %v1061_v43 = vpop.f32.mrb[13].mxu0 }
 0x44d   : > { %v881_v44 = vpop.f32.mrb[14].mxu0 }
 0x44e   : > { %884 = vst [vmem:[%s327_s25] sm:$0x1] %v879_v42  ;;  %v1062_v45 = vpop.f32.mrb[15].mxu0 }
 0x44f   : > { %1131 = shalt.err (!%p1128_p3)
}
 0x450   : > { %s1132_s22 = scalar_lea.hbm %s1438_s30, 16  ;;  %s1136_s27 = scalar_lea.hbm %s1489_s9, 48 }
 0x451   : > { %p1133_p4 = scmp.ne.s32.totalorder %s1438_s30, %s1132_s22  ;;  %p1137_p9 = scmp.lt.u32.totalorder %s1438_s30, %s1489_s9 }
 0x452   : > { %p1138_p10 = scmp.lt.u32.totalorder %s1136_s27, %s1132_s22  ;;  %p1140_p12 = scmp.lt.u32.totalorder %s1132_s22, %s1438_s30 }
 0x453   : > { %p1134_p7 = pnand %p1133_p4, %p1275_p5 }
 0x454   : > { %p1139_p11 = por %p1138_p10, %p1137_p9 }
 0x455   : > { %p1135_p8 = pneg %p1134_p7 }
 0x456   : > { %p1141_p13 = por %p1140_p12, %p1139_p11 }
 0x458   : > { %p1142_p0 = pnand %p1141_p13, %p1135_p8 }
 0x45a   : > { %1145 = shalt.err (!%p1142_p0)
}
 0x45b   : > { %1063 = dma.vmem_to_hbm [thread:$0]  (%p1275_p5), %s1440_s26, 16, %s1438_s30, %s886_s10  }
 0x45c PF: > { %p1069_p1 = scmp.ge.s32.totalorder %s1180_s14, 2  ;;  %s910_s29 = sand.u32 1, %s1168_s11  }
 0x45d   : > { %s911_s8 = scalar_lea.sflag [#allocation4], %s910_s29 }
 0x45e   : > { %p1066_p2 = pnand %p1069_p1, %p1279_p6 }
 0x460   : > { %1163 = dma.done.wait (!%p1066_p2), %s911_s8, 16  }
 0x461   : > { %1165 = vsyncadd (!%p1066_p2), %s911_s8, 4294967280  ;;  %p21_p3 = scmp.ge.s32.totalorder %s1263_s16, 5   ;;  %s1492_s11 = smov %s1172_s12 }
 0x462   : > { %s1493_s12 = smov %s1176_s13  ;;  %s1494_s13 = smov %s1273_s19 }
 0x463   : > { %s1495_s14 = smov %s1263_s16  ;;  %23 = sbr.rel (!%p21_p3) target bundleno = 6 (0x6), region = 91 }
 0x46a   :  { %915 = vsyncpa [#allocation4], 1 }
 0x46b   :  { %917 = vsyncpa [#allocation4 + $0x1], 1 }

</bundles_post_ra>
